<compile_context>
chip_gen: v5e
topology: v5e:2x2
jax: 0.10.0
libtpu: 0.0.40
codegen_flags: <defaults>
</compile_context>

<pallas_src>
import jax
import jax.numpy as jnp
from jax.experimental import pallas as pl
from jax.experimental.pallas import tpu as pltpu


def _hann_window(n_fft):
    # periodic hann window (torch.hann_window default)
    n = jnp.arange(n_fft, dtype=jnp.float32)
    return 0.5 - 0.5 * jnp.cos(2.0 * jnp.pi * n / n_fft)


def _round_up(x, m):
    return ((x + m - 1) // m) * m


def _make_kernel(num_transforms):
    """Fused multi-resolution spectrogram kernel.

    Ref order: [frames_k, wr_k, wi_k] * K, out.
    Per resolution (all within one grid step over a batch tile):
        re = Wr'_k @ frames_k            # (F_pad, TB*num_times)  MXU
        im = Wi'_k @ frames_k
        acc = max(acc, re*re + im*im)    # running max over resolutions, f32 (VPU)
    Freq/time nearest-bin remaps are already folded into Wr'/Wi' and the frames.
    """

    def kernel(*refs):
        out_ref = refs[-1]
        acc = None
        for k in range(num_transforms):
            frames_ref, wr_ref, wi_ref = refs[3 * k:3 * k + 3]
            ft = frames_ref[0]                                    # (K_pad_k, lanes)
            re = jnp.dot(wr_ref[...], ft, preferred_element_type=jnp.float32)
            im = jnp.dot(wi_ref[...], ft, preferred_element_type=jnp.float32)
            p = re * re + im * im                                 # f32 power spectrogram
            acc = p if acc is None else jnp.maximum(acc, p)
        out_ref[0] = acc

    return kernel


class MultiResolutionSpectrogram:
    """JAX/Pallas port of ml4gw.transforms.MultiResolutionSpectrogram.

    Supports the torchaudio.Spectrogram defaults: hann window, win_length=n_fft,
    hop_length=n_fft//2, center=True (reflect pad), onesided, power=2,
    normalized=True ("window" normalization).

    mxu_dtype=jnp.bfloat16 can be passed on v6e/v7x to halve base/frame VMEM and
    roughly double MXU throughput (squaring/max stay in f32 regardless).
    """

    def __init__(self, kernel_length, sample_rate, n_fft, hop_length=None,
                 mxu_dtype=jnp.float32, target_lanes=512,
                 vmem_budget_bytes=48 * 2**20):
        self.kernel_size = int(kernel_length * sample_rate)
        self.mxu_dtype = mxu_dtype
        self.target_lanes = int(target_lanes)
        self.vmem_budget_bytes = int(vmem_budget_bytes)

        n_fft = [int(n) for n in n_fft]
        if hop_length is None:
            hop_length = [n // 2 for n in n_fft]          # torchaudio default
        hop_length = [int(h) for h in hop_length]
        assert len(hop_length) == len(n_fft)

        T = self.kernel_size
        nfs = [n // 2 + 1 for n in n_fft]                 # onesided rFFT bins
        nts = [T // h + 1 for h in hop_length]            # center=True frame count
        self.num_freqs = max(nfs)
        self.num_times = max(nts)
        self.F_pad = _round_up(self.num_freqs, 8)         # sublane-aligned freq dim

        self.resolutions = []
        for n, h, nf, nt in zip(n_fft, hop_length, nfs, nts):
            win = _hann_window(n)
            scale = 1.0 / jnp.sqrt(jnp.sum(win * win))    # normalized=True ("window")
            k = jnp.arange(nf, dtype=jnp.float32)[:, None]
            t = jnp.arange(n, dtype=jnp.float32)[None, :]
            ang = 2.0 * jnp.pi * k * t / float(n)
            wr = jnp.cos(ang) * win[None, :] * scale      # (nf, n_fft)
            wi = jnp.sin(ang) * win[None, :] * scale
            # nearest-bin index maps (match int(i * shape / num) in the torch module)
            freq_map = (jnp.arange(self.num_freqs) * nf) // self.num_freqs
            time_map = (jnp.arange(self.num_times) * nt) // self.num_times
            # Fold the freq remap into the bases (row gather commutes with the
            # elementwise square); zero-pad to (F_pad, K_pad) for aligned layout.
            K_pad = _round_up(n, 8)
            wr_r = jnp.zeros((self.F_pad, K_pad), jnp.float32)
            wr_r = wr_r.at[:self.num_freqs, :n].set(wr[freq_map])
            wi_r = jnp.zeros((self.F_pad, K_pad), jnp.float32)
            wi_r = wi_r.at[:self.num_freqs, :n].set(wi[freq_map])
            self.resolutions.append(dict(
                n_fft=n, hop=h, nf=nf, nt=nt, K_pad=K_pad,
                wr=wr_r.astype(mxu_dtype), wi=wi_r.astype(mxu_dtype),
                time_map=time_map,
            ))

    # ---- tiling choice -------------------------------------------------------
    def _choose_tb(self, BC):
        """Largest batch tile TB such that TB*num_times ~ target_lanes and the
        per-step working set (double-buffered) fits the VMEM budget."""
        itemsize = jnp.dtype(self.mxu_dtype).itemsize
        tb = min(BC, max(1, -(-self.target_lanes // self.num_times)))
        while tb > 1:
            lanes = tb * self.num_times
            vmem = 2 * self.F_pad * lanes * 4                         # output (f32, 2 bufs)
            for r in self.resolutions:
                vmem += 2 * r["K_pad"] * lanes * itemsize             # frames (2 bufs)
                vmem += 2 * 2 * self.F_pad * r["K_pad"] * itemsize    # wr + wi (2 bufs)
            if vmem <= self.vmem_budget_bytes:
                break
            tb //= 2
        return tb

    # ---- forward -------------------------------------------------------------
    def __call__(self, X):
        B, C, T = X.shape
        if T != self.kernel_size:
            raise ValueError(
                f"Expected time dimension to be {self.kernel_size} samples long, "
                f"got input with {T} samples"
            )
        BC = B * C
        TB = self._choose_tb(BC)
        n_steps = -(-BC // TB)
        BC_pad = n_steps * TB
        lanes = TB * self.num_times
        itemsize = jnp.dtype(self.mxu_dtype).itemsize

        Xf = X.reshape(BC, T).astype(jnp.float32)
        if BC_pad != BC:
            Xf = jnp.pad(Xf, ((0, BC_pad - BC), (0, 0)))

        # TODO(synk): build frames in-kernel from a single DMA of the reflect-padded
        # signal (overlapping pl.ds windows) to avoid the ~2x-per-resolution HBM
        # expansion of materialized frames.
        inputs, in_specs = [], []
        flops = 0
        bytes_accessed = 0
        for r in self.resolutions:
            n, h, K_pad = r["n_fft"], r["hop"], r["K_pad"]
            pad = n // 2
            xp = jnp.pad(Xf, ((0, 0), (pad, pad)), mode="reflect")   # center=True
            # nearest-time-bin remap folded into the frame gather:
            starts = r["time_map"] * h                               # (num_times,)
            idx = starts[:, None] + jnp.arange(n)[None, :]           # (num_times, n_fft)
            frames = xp[:, idx]                                      # (BC_pad, num_times, n_fft)
            # -> (n_steps, K_pad, TB*num_times): contraction on sublanes, batch*time
            # flattened onto the lane axis (lane-dense matmul N dimension).
            frames = frames.reshape(n_steps, TB, self.num_times, n)
            frames = jnp.transpose(frames, (0, 3, 1, 2)).reshape(n_steps, n, lanes)
            if K_pad != n:
                frames = jnp.pad(frames, ((0, 0), (0, K_pad - n), (0, 0)))
            frames = frames.astype(self.mxu_dtype)

            inputs += [frames, r["wr"], r["wi"]]
            in_specs += [
                pl.BlockSpec((1, K_pad, lanes), lambda i: (i, 0, 0)),
                pl.BlockSpec((self.F_pad, K_pad), lambda i: (0, 0)),
                pl.BlockSpec((self.F_pad, K_pad), lambda i: (0, 0)),
            ]
            flops += n_steps * 4 * self.F_pad * K_pad * lanes        # two MXU matmuls
            flops += n_steps * 3 * self.F_pad * lanes                # square/add/max
            bytes_accessed += frames.size * itemsize
            bytes_accessed += 2 * self.F_pad * K_pad * itemsize      # bases read once
        bytes_accessed += n_steps * self.F_pad * lanes * 4           # f32 output

        # Explicit VMEM budget (v7x default scoped limit is 32 MiB of 64 MiB physical).
        vmem_est = 2 * self.F_pad * lanes * 4
        for r in self.resolutions:
            vmem_est += 2 * r["K_pad"] * lanes * itemsize
            vmem_est += 2 * 2 * self.F_pad * r["K_pad"] * itemsize
        vmem_limit = int(min(100 * 2**20, max(32 * 2**20, 2 * vmem_est)))

        # TODO(synk): for very large num_freqs (e.g. n_fft=2048 on v7x) add a second
        # grid axis tiling F_pad so the bases need not be fully VMEM-resident.
        out = pl.pallas_call(
            _make_kernel(len(self.resolutions)),
            out_shape=jax.ShapeDtypeStruct((n_steps, self.F_pad, lanes), jnp.float32),
            grid=(n_steps,),
            in_specs=in_specs,
            out_specs=pl.BlockSpec((1, self.F_pad, lanes), lambda i: (i, 0, 0)),
            compiler_params=pltpu.CompilerParams(
                dimension_semantics=("parallel",),
                vmem_limit_bytes=vmem_limit,
            ),
            cost_estimate=pl.CostEstimate(
                flops=int(flops), transcendentals=0,
                bytes_accessed=int(bytes_accessed)),
        )(*inputs)

        # (n_steps, F_pad, TB*num_times) -> (B, C, num_freqs, num_times)
        out = out.reshape(n_steps, self.F_pad, TB, self.num_times)
        out = jnp.transpose(out, (0, 2, 1, 3)).reshape(BC_pad, self.F_pad, self.num_times)
        out = out[:BC, :self.num_freqs, :]
        return out.reshape(B, C, self.num_freqs, self.num_times)

    # ---- pure-JAX FFT reference ---------------------------------------------
    def reference(self, X):
        """Pure-JAX (FFT based) reference of the same forward semantics."""
        remapped = []
        for r in self.resolutions:
            n, h, nf, nt = r["n_fft"], r["hop"], r["nf"], r["nt"]
            pad = n // 2
            xp = jnp.pad(X, ((0, 0), (0, 0), (pad, pad)), mode="reflect")
            idx = jnp.arange(nt)[:, None] * h + jnp.arange(n)[None, :]
            frames = xp[..., idx]                             # (B, C, nt, n_fft)
            win = _hann_window(n)
            stft = jnp.fft.rfft(frames * win, axis=-1)
            spec = (jnp.abs(stft) ** 2) / jnp.sum(win * win)  # (B, C, nt, nf)
            spec = jnp.transpose(spec, (0, 1, 3, 2))          # (B, C, nf, nt)
            fm = (jnp.arange(self.num_freqs) * nf) // self.num_freqs
            tm = (jnp.arange(self.num_times) * nt) // self.num_times
            remapped.append(spec[:, :, fm][:, :, :, tm])
        return jnp.max(jnp.stack(remapped), axis=0)


if __name__ == "__main__":
    # Small, deterministic example: B=2, C=3, 1 s @ 128 Hz -> T=128,
    # two STFT resolutions n_fft = [32, 64] -> output (2, 3, 33, 9).
    kernel_length, sample_rate = 1.0, 128.0
    B, C = 2, 3
    T = int(kernel_length * sample_rate)

    mod = MultiResolutionSpectrogram(kernel_length, sample_rate, n_fft=[32, 64])
    X = jax.random.normal(jax.random.PRNGKey(0), (B, C, T), dtype=jnp.float32)

    out = jax.block_until_ready(mod(X))
    assert out.shape == (B, C, mod.num_freqs, mod.num_times), out.shape

    ref = mod.reference(X)
    err = float(jnp.max(jnp.abs(out - ref)))
    scale = float(jnp.max(jnp.abs(ref))) + 1e-12
    # MXU f32 matmuls use default precision; allow a small relative slack.
    assert err <= 2e-2 * scale, f"max abs err {err} vs scale {scale}"

    print("KERNEL_OK")
</pallas_src>

<mosaic_0001>
module attributes {stable_mosaic.version = 11 : i64} {
  func.func @kernel(%arg0: i32, %arg1: memref<1x32x54xf32, #tpu.memory_space<vmem>>, %arg2: memref<40x32xf32, #tpu.memory_space<vmem>>, %arg3: memref<40x32xf32, #tpu.memory_space<vmem>>, %arg4: memref<1x64x54xf32, #tpu.memory_space<vmem>>, %arg5: memref<40x64xf32, #tpu.memory_space<vmem>>, %arg6: memref<40x64xf32, #tpu.memory_space<vmem>>, %arg7: memref<1x40x54xf32, #tpu.memory_space<vmem>>) attributes {dimension_semantics = [#tpu.dimension_semantics<parallel>], iteration_bounds = array<i64: 1>, scalar_prefetch = 0 : i64, scratch_operands = 0 : i64, tpu.core_type = #tpu.core_type<tc>, window_params = [{transform_indices = @transform_0, window_bounds = array<i64: 1, 32, 54>}, {pipeline_mode = #tpu.pipeline_mode<synchronous>, transform_indices = @transform_1, window_bounds = array<i64: 40, 32>}, {pipeline_mode = #tpu.pipeline_mode<synchronous>, transform_indices = @transform_2, window_bounds = array<i64: 40, 32>}, {transform_indices = @transform_3, window_bounds = array<i64: 1, 64, 54>}, {pipeline_mode = #tpu.pipeline_mode<synchronous>, transform_indices = @transform_4, window_bounds = array<i64: 40, 64>}, {pipeline_mode = #tpu.pipeline_mode<synchronous>, transform_indices = @transform_5, window_bounds = array<i64: 40, 64>}, {transform_indices = @transform_6, window_bounds = array<i64: 1, 40, 54>}]} {
    %c0 = arith.constant 0 : index
    %c0_0 = arith.constant 0 : index
    %c0_1 = arith.constant 0 : index
    %0 = vector.load %arg1[%c0, %c0_0, %c0_1] : memref<1x32x54xf32, #tpu.memory_space<vmem>>, vector<1x32x54xf32>
    %1 = vector.shape_cast %0 : vector<1x32x54xf32> to vector<32x54xf32>
    %c0_2 = arith.constant 0 : index
    %c0_3 = arith.constant 0 : index
    %2 = vector.load %arg2[%c0_2, %c0_3] : memref<40x32xf32, #tpu.memory_space<vmem>>, vector<40x32xf32>
    %cst = arith.constant dense<0.000000e+00> : vector<40x54xf32>
    %3 = tpu.matmul %2, %1, %cst {dimension_numbers = #tpu.dot_dimension_numbers<[1], [0], [0], [1], [0, 0, 1, 1], [], []>} : vector<40x32xf32>, vector<32x54xf32>, vector<40x54xf32> -> vector<40x54xf32>
    %c0_4 = arith.constant 0 : index
    %c0_5 = arith.constant 0 : index
    %4 = vector.load %arg3[%c0_4, %c0_5] : memref<40x32xf32, #tpu.memory_space<vmem>>, vector<40x32xf32>
    %cst_6 = arith.constant dense<0.000000e+00> : vector<40x54xf32>
    %5 = tpu.matmul %4, %1, %cst_6 {dimension_numbers = #tpu.dot_dimension_numbers<[1], [0], [0], [1], [0, 0, 1, 1], [], []>} : vector<40x32xf32>, vector<32x54xf32>, vector<40x54xf32> -> vector<40x54xf32>
    %6 = arith.mulf %3, %3 : vector<40x54xf32>
    %7 = arith.mulf %5, %5 : vector<40x54xf32>
    %8 = arith.addf %6, %7 : vector<40x54xf32>
    %c0_7 = arith.constant 0 : index
    %c0_8 = arith.constant 0 : index
    %c0_9 = arith.constant 0 : index
    %9 = vector.load %arg4[%c0_7, %c0_8, %c0_9] : memref<1x64x54xf32, #tpu.memory_space<vmem>>, vector<1x64x54xf32>
    %10 = vector.shape_cast %9 : vector<1x64x54xf32> to vector<64x54xf32>
    %c0_10 = arith.constant 0 : index
    %c0_11 = arith.constant 0 : index
    %11 = vector.load %arg5[%c0_10, %c0_11] : memref<40x64xf32, #tpu.memory_space<vmem>>, vector<40x64xf32>
    %cst_12 = arith.constant dense<0.000000e+00> : vector<40x54xf32>
    %12 = tpu.matmul %11, %10, %cst_12 {dimension_numbers = #tpu.dot_dimension_numbers<[1], [0], [0], [1], [0, 0, 1, 1], [], []>} : vector<40x64xf32>, vector<64x54xf32>, vector<40x54xf32> -> vector<40x54xf32>
    %c0_13 = arith.constant 0 : index
    %c0_14 = arith.constant 0 : index
    %13 = vector.load %arg6[%c0_13, %c0_14] : memref<40x64xf32, #tpu.memory_space<vmem>>, vector<40x64xf32>
    %cst_15 = arith.constant dense<0.000000e+00> : vector<40x54xf32>
    %14 = tpu.matmul %13, %10, %cst_15 {dimension_numbers = #tpu.dot_dimension_numbers<[1], [0], [0], [1], [0, 0, 1, 1], [], []>} : vector<40x64xf32>, vector<64x54xf32>, vector<40x54xf32> -> vector<40x54xf32>
    %15 = arith.mulf %12, %12 : vector<40x54xf32>
    %16 = arith.mulf %14, %14 : vector<40x54xf32>
    %17 = arith.addf %15, %16 : vector<40x54xf32>
    %18 = arith.maximumf %8, %17 : vector<40x54xf32>
    %c0_16 = arith.constant 0 : index
    %c0_17 = arith.constant 0 : index
    %c0_18 = arith.constant 0 : index
    %19 = vector.load %arg7[%c0_16, %c0_17, %c0_18] : memref<1x40x54xf32, #tpu.memory_space<vmem>>, vector<1x40x54xf32>
    %20 = vector.shape_cast %19 : vector<1x40x54xf32> to vector<40x54xf32>
    %21 = vector.shape_cast %18 : vector<40x54xf32> to vector<1x40x54xf32>
    tpu.vector_store %arg7[%c0_16, %c0_17, %c0_18], %21 {strides = array<i32>} : memref<1x40x54xf32, #tpu.memory_space<vmem>>, vector<1x40x54xf32>,
    return
  }
  func.func @transform_0(%arg0: i32) -> (i32, i32, i32) {
    %c0_i32 = arith.constant 0 : i32
    %c0_i32_0 = arith.constant 0 : i32
    %c0_i32_1 = arith.constant 0 : i32
    return %arg0, %c0_i32, %c0_i32_0 : i32, i32, i32
  }
  func.func @transform_1(%arg0: i32) -> (i32, i32) {
    %c0_i32 = arith.constant 0 : i32
    %c0_i32_0 = arith.constant 0 : i32
    %c0_i32_1 = arith.constant 0 : i32
    return %c0_i32, %c0_i32_0 : i32, i32
  }
  func.func @transform_2(%arg0: i32) -> (i32, i32) {
    %c0_i32 = arith.constant 0 : i32
    %c0_i32_0 = arith.constant 0 : i32
    %c0_i32_1 = arith.constant 0 : i32
    return %c0_i32, %c0_i32_0 : i32, i32
  }
  func.func @transform_3(%arg0: i32) -> (i32, i32, i32) {
    %c0_i32 = arith.constant 0 : i32
    %c0_i32_0 = arith.constant 0 : i32
    %c0_i32_1 = arith.constant 0 : i32
    return %arg0, %c0_i32, %c0_i32_0 : i32, i32, i32
  }
  func.func @transform_4(%arg0: i32) -> (i32, i32) {
    %c0_i32 = arith.constant 0 : i32
    %c0_i32_0 = arith.constant 0 : i32
    %c0_i32_1 = arith.constant 0 : i32
    return %c0_i32, %c0_i32_0 : i32, i32
  }
  func.func @transform_5(%arg0: i32) -> (i32, i32) {
    %c0_i32 = arith.constant 0 : i32
    %c0_i32_0 = arith.constant 0 : i32
    %c0_i32_1 = arith.constant 0 : i32
    return %c0_i32, %c0_i32_0 : i32, i32
  }
  func.func @transform_6(%arg0: i32) -> (i32, i32, i32) {
    %c0_i32 = arith.constant 0 : i32
    %c0_i32_0 = arith.constant 0 : i32
    %c0_i32_1 = arith.constant 0 : i32
    return %arg0, %c0_i32, %c0_i32_0 : i32, i32, i32
  }
}

</mosaic_0001>

<bundles_post_ra>
// kernel: tpu_custom_call.1
= control target key start
LH: loop header
LB: loop body
LE: loop exit
PB: predicated region body
PF: predicated region fallthrough
CT: control target
= control target key end

     0   :  { %vm33_vm0 = vcmask 261120   ;;  %s516_s0 = inlined_call_operand.vmem [shape: f32[1,32,54], index: 0, kind: input, shape index: {}]   ;;  %s517_s1 = inlined_call_operand.vmem [shape: f32[40,32], index: 1, kind: input, shape index: {}]   ;;  %s518_s2 = inlined_call_operand.vmem [shape: f32[40,32], index: 2, kind: input, shape index: {}]   ;;  %s519_s3 = inlined_call_operand.vmem [shape: f32[1,64,54], index: 3, kind: input, shape index: {}]   ;;  %s520_s4 = inlined_call_operand.vmem [shape: f32[40,64], index: 4, kind: input, shape index: {}]   ;;  %s521_s5 = inlined_call_operand.vmem [shape: f32[40,64], index: 5, kind: input, shape index: {}]   ;;  %s522_s6 = inlined_call_operand.hbm [shape: f32[1,40,54], index: 6, kind: output, shape index: {}]  }
   0x1   :  { %v155_v0 = vld [vmem:[%s519_s3 + $0x38] sm:$0xff]  ;;  %v154_v1 = vld [vmem:[%s519_s3 + $0x30] sm:$0xff]  ;;  %v153_v2 = vld [vmem:[%s519_s3 + $0x28] sm:$0xff] }
   0x2   :  { %185 = vmatpush.msra.mxu2 %v155_v0  ;;  %237 = vmatpush.msra.mxu3 %v155_v0  ;;  %v27_v3 = vld [vmem:[%s516_s0 + $0x18] sm:$0xff]  ;;  %v26_v4 = vld [vmem:[%s516_s0 + $0x10] sm:$0xff]  ;;  %v152_v5 = vld [vmem:[%s519_s3 + $0x20] sm:$0xff] }
   0x3   :  { %61 = vmatpush.msra.mxu0 %v27_v3  ;;  %113 = vmatpush.msra.mxu1 %v27_v3  ;;  %v25_v6 = vld [vmem:[%s516_s0 + $0x8] sm:$0xff]  ;;  %v151_v7 = vld [vmem:[%s519_s3 + $0x18] sm:$0xff]  ;;  %v24_v8 = vld [vmem:[%s516_s0] sm:$0xff] }
   0x4   :  { %186 = vmatpush.msra.mxu2 %v154_v1  ;;  %238 = vmatpush.msra.mxu3 %v154_v1  ;;  %v150_v9 = vld [vmem:[%s519_s3 + $0x10] sm:$0xff]  ;;  %v28_v10 = vld [vmem:[%s517_s1] sm:$0xff] }
   0x5   :  { %62 = vmatpush.msra.mxu0 %v26_v4  ;;  %114 = vmatpush.msra.mxu1 %v26_v4  ;;  %v81_v11 = vld [vmem:[%s518_s2] sm:$0xff] }
   0x6   :  { %187 = vmatpush.msra.mxu2 %v153_v2  ;;  %239 = vmatpush.msra.mxu3 %v153_v2 }
   0x7   :  { %63 = vmatpush.msra.mxu0 %v25_v6  ;;  %115 = vmatpush.msra.mxu1 %v25_v6 }
   0x8   :  { %188 = vmatpush.msra.mxu2 %v152_v5  ;;  %240 = vmatpush.msra.mxu3 %v152_v5 }
   0xa   :  { %189 = vmatpush.msra.mxu2 %v151_v7  ;;  %241 = vmatpush.msra.mxu3 %v151_v7 }
   0xb   :  { %11 = vsyncpa [#allocation3], 0  ;;  %v149_v12 = vld [vmem:[%s519_s3 + $0x8] sm:$0xff]  ;;  %64 = vmatpush.msra.mxu0 %v24_v8  ;;  %116 = vmatpush.msra.mxu1 %v24_v8  ;;  %v148_v13 = vld [vmem:[%s519_s3] sm:$0xff]  ;;  %vm161_vm1 = vcmask 523264   ;;  %vm281_vm2 = vcmask 441344  }
   0xc   :  { %190 = vmatpush.msra.mxu2 %v150_v9  ;;  %242 = vmatpush.msra.mxu3 %v150_v9  ;;  %v156_v14 = vld [vmem:[%s520_s4] sm:$0xff]  ;;  %v29_v16 = vld [vmem:[%s517_s1 + $0x8] sm:$0xff]  ;;  %v30_v20 = vld [vmem:[%s517_s1 + $0x10] sm:$0xff]  ;;  %s293_s9 = sshll.u32 %s522_s6, 4  ;;  %s355_s10 = smov 128   ;;  %s294_s9 = int_to_ptr.hbm [resolvable:$true] %s293_s9 }
   0xd   :  { %305 = vmatmul.msk.f32.vlgmr.msra.gmra.mxu0 %vm33_vm0, %v28_v10  ;;  %310 = vmatmul.msk.f32.vlgmr.msra.gmra.mxu1 %vm33_vm0, %v81_v11  ;;  %v209_v15 = vld [vmem:[%s521_s5] sm:$0xff]  ;;  %v82_v17 = vld [vmem:[%s518_s2 + $0x8] sm:$0xff]  ;;  %v83_v21 = vld [vmem:[%s518_s2 + $0x10] sm:$0xff]  ;;  %s356_s11 = smov 8  }
   0xe   :  { %191 = vmatpush.msra.mxu2 %v149_v12  ;;  %243 = vmatpush.msra.mxu3 %v149_v12  ;;  %v157_v18 = vld [vmem:[%s520_s4 + $0x8] sm:$0xff]  ;;  %v158_v22 = vld [vmem:[%s520_s4 + $0x10] sm:$0xff]  ;;  %v31_v24 = vld [vmem:[%s517_s1 + $0x18] sm:$0xff] }
   0xf   :  { %v210_v19 = vld [vmem:[%s521_s5 + $0x8] sm:$0xff]  ;;  %v211_v23 = vld [vmem:[%s521_s5 + $0x10] sm:$0xff]  ;;  %v84_v25 = vld [vmem:[%s518_s2 + $0x18] sm:$0xff] }
  0x10   :  { %192 = vmatpush.msra.mxu2 %v148_v13  ;;  %244 = vmatpush.msra.mxu3 %v148_v13  ;;  %v159_v26 = vld [vmem:[%s520_s4 + $0x18] sm:$0xff]  ;;  %v32_v28 = vld [vmem:[%s517_s1 + $0x20] sm:$0xff]  ;;  %s354_s1 = smov [#allocation2]  }
  0x11   :  { %315 = vmatmul.msk.f32.vlgmr.msra.gmra.mxu2 %vm161_vm1, %v156_v14  ;;  %320 = vmatmul.msk.f32.vlgmr.msra.gmra.mxu3 %vm161_vm1, %v209_v15  ;;  %v212_v27 = vld [vmem:[%s521_s5 + $0x18] sm:$0xff]  ;;  %v85_v29 = vld [vmem:[%s518_s2 + $0x20] sm:$0xff]  ;;  %s291_s2 = sshll.u32 %s354_s1, 4  ;;  %s292_s2 = int_to_ptr.vmem [resolvable:$true] %s291_s2 }
  0x12   :  { %v160_v30 = vld [vmem:[%s520_s4 + $0x20] sm:$0xff] }
  0x13   :  { %v213_v31 = vld [vmem:[%s521_s5 + $0x20] sm:$0xff] }
  0x15   :  { %306 = vmatmul.msk.f32.gmra.mxu0 %vm33_vm0, %v29_v16  ;;  %311 = vmatmul.msk.f32.gmra.mxu1 %vm33_vm0, %v82_v17 }
  0x19   :  { %316 = vmatmul.msk.f32.gmra.mxu2 %vm161_vm1, %v157_v18  ;;  %321 = vmatmul.msk.f32.gmra.mxu3 %vm161_vm1, %v210_v19 }
  0x1d   :  { %307 = vmatmul.msk.f32.gmra.mxu0 %vm33_vm0, %v30_v20  ;;  %312 = vmatmul.msk.f32.gmra.mxu1 %vm33_vm0, %v83_v21 }
  0x21   :  { %317 = vmatmul.msk.f32.gmra.mxu2 %vm161_vm1, %v158_v22  ;;  %322 = vmatmul.msk.f32.gmra.mxu3 %vm161_vm1, %v211_v23 }
  0x25   :  { %308 = vmatmul.msk.f32.gmra.mxu0 %vm33_vm0, %v31_v24  ;;  %313 = vmatmul.msk.f32.gmra.mxu1 %vm33_vm0, %v84_v25 }
  0x29   :  { %318 = vmatmul.msk.f32.gmra.mxu2 %vm161_vm1, %v159_v26  ;;  %323 = vmatmul.msk.f32.gmra.mxu3 %vm161_vm1, %v212_v27 }
  0x2d   :  { %309 = vmatmul.msk.f32.gmra.mxu0 %vm33_vm0, %v32_v28  ;;  %314 = vmatmul.msk.f32.gmra.mxu1 %vm33_vm0, %v85_v29 }
  0x31   :  { %319 = vmatmul.msk.f32.gmra.mxu2 %vm161_vm1, %v160_v30  ;;  %324 = vmatmul.msk.f32.gmra.mxu3 %vm161_vm1, %v213_v31 }
  0x8a   :  { %v66_v32 = vpop.f32.mrf.mxu0  ;;  %v118_v33 = vpop.f32.mrf.mxu1 }
  0x8b   :  { %v133_v34 = vmul.f32 %v66_v32, %v66_v32  ;;  %v138_v35 = vmul.f32 %v118_v33, %v118_v33 }
  0x8d   :  { %v143_v40 = vadd.f32 %v138_v35, %v133_v34 }
  0x92   :  { %v69_v36 = vpop.f32.mrf.mxu0  ;;  %v121_v37 = vpop.f32.mrf.mxu1 }
  0x93   :  { %v134_v45 = vmul.f32 %v69_v36, %v69_v36  ;;  %v139_v46 = vmul.f32 %v121_v37, %v121_v37 }
  0x94   :  { %v194_v38 = vpop.f32.mrf.mxu2  ;;  %v246_v39 = vpop.f32.mrf.mxu3 }
  0x95   :  { %v261_v41 = vmul.f32 %v194_v38, %v194_v38  ;;  %v266_v42 = vmul.f32 %v246_v39, %v246_v39  ;;  %v144_v51 = vadd.f32 %v139_v46, %v134_v45 }
  0x97   :  { %v271_v43 = vadd.f32 %v266_v42, %v261_v41 }
  0x99   :  { %v276_v44 = vmax.f32 %v143_v40, %v271_v43 }
  0x9a   :  { %v72_v47 = vpop.f32.mrf.mxu0  ;;  %v124_v48 = vpop.f32.mrf.mxu1 }
  0x9b   :  { %282 = vst.msk [vmem:[#allocation2] sm:$0xff] %vm281_vm2, %v276_v44  ;;  %v135_v56 = vmul.f32 %v72_v47, %v72_v47  ;;  %v140_v57 = vmul.f32 %v124_v48, %v124_v48 }
  0x9c   :  { %v197_v49 = vpop.f32.mrf.mxu2  ;;  %v249_v50 = vpop.f32.mrf.mxu3 }
  0x9d   :  { %v262_v52 = vmul.f32 %v197_v49, %v197_v49  ;;  %v267_v53 = vmul.f32 %v249_v50, %v249_v50  ;;  %v145_v62 = vadd.f32 %v140_v57, %v135_v56 }
  0x9f   :  { %v272_v54 = vadd.f32 %v267_v53, %v262_v52 }
  0xa1   :  { %v277_v55 = vmax.f32 %v144_v51, %v272_v54 }
  0xa2   :  { %v75_v58 = vpop.f32.mrf.mxu0  ;;  %v127_v59 = vpop.f32.mrf.mxu1 }
  0xa3   :  { %283 = vst.msk [vmem:[#allocation2 + $0x8] sm:$0xff] %vm281_vm2, %v277_v55  ;;  %v136_v3 = vmul.f32 %v75_v58, %v75_v58  ;;  %v141_v4 = vmul.f32 %v127_v59, %v127_v59 }
  0xa4   :  { %v200_v60 = vpop.f32.mrf.mxu2  ;;  %v252_v61 = vpop.f32.mrf.mxu3 }
  0xa5   :  { %v263_v63 = vmul.f32 %v200_v60, %v200_v60  ;;  %v268_v0 = vmul.f32 %v252_v61, %v252_v61  ;;  %v146_v7 = vadd.f32 %v141_v4, %v136_v3 }
  0xa7   :  { %v273_v1 = vadd.f32 %v268_v0, %v263_v63 }
  0xa9   :  { %v278_v2 = vmax.f32 %v145_v62, %v273_v1 }
  0xaa   :  { %v78_v10 = vpop.f32.mrf.mxu0  ;;  %v130_v11 = vpop.f32.mrf.mxu1 }
  0xab   :  { %284 = vst.msk [vmem:[#allocation2 + $0x10] sm:$0xff] %vm281_vm2, %v278_v2  ;;  %v137_v14 = vmul.f32 %v78_v10, %v78_v10  ;;  %v142_v15 = vmul.f32 %v130_v11, %v130_v11 }
  0xac   :  { %v203_v5 = vpop.f32.mrf.mxu2  ;;  %v255_v6 = vpop.f32.mrf.mxu3 }
  0xad   :  { %v264_v8 = vmul.f32 %v203_v5, %v203_v5  ;;  %v269_v9 = vmul.f32 %v255_v6, %v255_v6  ;;  %v147_v18 = vadd.f32 %v142_v15, %v137_v14 }
  0xaf   :  { %v274_v12 = vadd.f32 %v269_v9, %v264_v8 }
  0xb1   :  { %v279_v13 = vmax.f32 %v146_v7, %v274_v12 }
  0xb3   :  { %285 = vst.msk [vmem:[#allocation2 + $0x18] sm:$0xff] %vm281_vm2, %v279_v13 }
  0xb4   :  { %v206_v16 = vpop.f32.mrf.mxu2  ;;  %v258_v17 = vpop.f32.mrf.mxu3 }
  0xb5   :  { %v265_v19 = vmul.f32 %v206_v16, %v206_v16  ;;  %v270_v20 = vmul.f32 %v258_v17, %v258_v17 }
  0xb7   :  { %v275_v21 = vadd.f32 %v270_v20, %v265_v19 }
  0xb9   :  { %v280_v22 = vmax.f32 %v147_v18, %v275_v21 }
  0xbb   :  { %286 = vst.msk [vmem:[#allocation2 + $0x20] sm:$0xff] %vm281_vm2, %v280_v22 }
  0xbc   :  { %299 = dma.vmem_to_hbm [thread:$0]  %s292_s2, 640, %s294_s9, [#allocation3], %s355_s10, %s355_s10, %s356_s11  }
  0xbd   :  { %352 = dma.done.wait [#allocation3], 640  }
  0xbe   :  { %353 = vsyncadd [#allocation3], 4294966656 }
  0xbf   :  { %304 = vsyncpa [#allocation3], 1 }

</bundles_post_ra>
